<compile_context>
chip_gen: v6e
topology: v6e:2x2x1
jax: 0.10.0
libtpu: 0.0.40
codegen_flags: <defaults>
</compile_context>

<pallas_src>
import jax
import jax.numpy as jnp
import numpy as np
from jax.experimental import pallas as pl
from jax.experimental.pallas import tpu as pltpu

# ---- static sizes implied by the module (input_dim = 16 for this script) ---------
INPUT_DIM = 16
K1, C1_IN, C1_OUT = 6, 1, 3
K2, C2_OUT = 4, 9
P1 = K1 // 2                   # conv1 padding = 3
P2 = K2 // 2                   # conv2 padding = 2
XP = INPUT_DIM + 2 * P1        # padded conv1 input length = 22
L1 = INPUT_DIM + 1             # conv1 output length = 17
L2 = INPUT_DIM + 2             # conv2 output length = 18
LIN1_IN = L2 * C2_OUT          # 162
LIN1_OUT = INPUT_DIM           # 16
LIN2_OUT = 12
LIN3_OUT = 1


def _r8(n):
    return ((n + 7) // 8) * 8


# ---- packed-parameter buffer layout for the single-sample kernel -----------------
# 256 lanes (not 162) so the one param DMA and every row read are (8,128)-aligned.
LANES = 256
W1_R = 0                                   # (3, 6)      conv1 weight (in-ch squeezed)
B1_R = W1_R + _r8(C1_OUT)                  # (3, 1)      conv1 bias column
W2_R = B1_R + _r8(C1_OUT)                  # (9, 12)     w2col[o, c*K2+k] = w2[o,c,k]
B2_R = W2_R + _r8(C2_OUT)                  # (9, 1)      conv2 bias column
WL1_R = B2_R + _r8(C2_OUT)                 # (144, 18)   wl1 repacked per conv2 channel
WL1_BLK = _r8(LIN1_OUT)                    #   block c: rows [WL1_R+c*16, +16), lanes [0,18)
BL1_R = WL1_R + C2_OUT * WL1_BLK           # (16, 1)     lin1 bias column
WL2T_R = BL1_R + _r8(LIN1_OUT)             # (16, 12)    lin2 weight transposed
BL2_R = WL2T_R + _r8(LIN1_OUT)             # (1, 12)     lin2 bias row
WL3_R = BL2_R + 8                          # (1, 12)     lin3 weight row
BL3_R = WL3_R + 8                          # (1, 1)      lin3 bias
TOTAL_ROWS = BL3_R + 8                     # 248 rows x 256 lanes x f32 ~ 248 KiB


# ==================================================================================
# Single-sample kernel (module-exact: batch = 1, as hard-coded by x.view(1,1,162))
# ==================================================================================
def _qrs_kernel(x_ref, p_ref, o_ref):
    f32 = jnp.float32

    # ---- hoisted parameter block loads: one VMEM read per block, sliced in regs --
    w1 = p_ref[W1_R:W1_R + C1_OUT, 0:K1]                    # (3, 6)
    b1 = p_ref[B1_R:B1_R + C1_OUT, 0:1]                     # (3, 1)
    w2 = p_ref[W2_R:W2_R + C2_OUT, 0:C1_OUT * K2]           # (9, 12)
    b2 = p_ref[B2_R:B2_R + C2_OUT, 0:1]                     # (9, 1)
    wl1 = p_ref[WL1_R:WL1_R + C2_OUT * WL1_BLK, 0:L2]       # (144, 18)
    bl1 = p_ref[BL1_R:BL1_R + LIN1_OUT, 0:1]                # (16, 1)
    wl2t = p_ref[WL2T_R:WL2T_R + LIN1_OUT, 0:LIN2_OUT]      # (16, 12)
    bl2 = p_ref[BL2_R:BL2_R + 1, 0:LIN2_OUT]                # (1, 12)
    wl3 = p_ref[WL3_R:WL3_R + 1, 0:LIN2_OUT]                # (1, 12)
    bl3 = p_ref[BL3_R:BL3_R + 1, 0:1]                       # (1, 1)

    xpad = x_ref[...]                                       # (1, 22) pre-padded in wrapper

    # ---- conv1 + ReLU (6 VPU FMAs) -----------------------------------------------
    c1 = jnp.zeros((C1_OUT, L1), f32)
    for k in range(K1):
        c1 = c1 + w1[:, k:k + 1] * xpad[:, k:k + L1]        # (3,1)*(1,17) -> (3,17)
    c1 = jnp.maximum(c1 + b1, 0.0)                          # (3, 17)

    # pad conv1 output for conv2 (tiny, must stay in-kernel: comes after the ReLU)
    zc = jnp.zeros((C1_OUT, P2), f32)
    c1p = jnp.concatenate([zc, c1, zc], axis=1)             # (3, 21)

    # ---- conv2 + ReLU as a (9, 18) channel-on-sublane tile (12 VPU FMAs) ---------
    # no lane replication: same layout discipline as conv1
    c2 = jnp.zeros((C2_OUT, L2), f32)
    for k in range(K2):
        win = c1p[:, k:k + L2]                              # (3, 18)  one lane shift
        for c in range(C1_OUT):
            j = c * K2 + k
            c2 = c2 + w2[:, j:j + 1] * win[c:c + 1, :]      # (9,1)*(1,18) -> (9,18)
    c2 = jnp.maximum(c2 + b2, 0.0)                          # (9, 18)

    # ---- lin1 + ReLU: 9 FMAs into a (16,18) accumulator, then ONE lane reduction -
    # wl1 block c holds wl1[:, c*18:(c+1)*18]; c2 row c is the matching activations.
    acc = jnp.zeros((LIN1_OUT, L2), f32)
    for c in range(C2_OUT):
        r = c * WL1_BLK
        acc = acc + wl1[r:r + LIN1_OUT, :] * c2[c:c + 1, :]
    y1 = jnp.maximum(jnp.sum(acc, axis=1, keepdims=True) + bl1, 0.0)   # (16, 1)

    # ---- lin2 + ReLU (broadcast-mul + sublane reduce) -----------------------------
    y2 = jnp.maximum(jnp.sum(wl2t * y1, axis=0, keepdims=True) + bl2, 0.0)   # (1, 12)

    # ---- lin3 + sigmoid -----------------------------------------------------------
    z = jnp.sum(wl3 * y2, axis=1, keepdims=True) + bl3      # (1, 1)
    o_ref[...] = jax.nn.sigmoid(z)


def pack_params(params):
    """One-time re-layout of all parameters into a single (248, 256) f32 buffer."""
    w1, b1, w2, b2, wl1, bl1, wl2, bl2, wl3, bl3 = [np.asarray(p, np.float32)
                                                    for p in params]
    P = np.zeros((TOTAL_ROWS, LANES), np.float32)
    P[W1_R:W1_R + C1_OUT, :K1] = w1[:, 0, :]
    P[B1_R:B1_R + C1_OUT, 0] = b1
    P[W2_R:W2_R + C2_OUT, :C1_OUT * K2] = w2.reshape(C2_OUT, C1_OUT * K2)
    P[B2_R:B2_R + C2_OUT, 0] = b2
    # wl1 repack: block c (rows WL1_R+c*16 .. +16, lanes 0..18) = wl1[:, c*18:(c+1)*18]
    wl1r = wl1.reshape(LIN1_OUT, C2_OUT, L2).transpose(1, 0, 2)      # (9, 16, 18)
    for c in range(C2_OUT):
        r = WL1_R + c * WL1_BLK
        P[r:r + LIN1_OUT, :L2] = wl1r[c]
    P[BL1_R:BL1_R + LIN1_OUT, 0] = bl1
    P[WL2T_R:WL2T_R + LIN1_OUT, :LIN2_OUT] = wl2.T
    P[BL2_R, :LIN2_OUT] = bl2
    P[WL3_R, :LIN2_OUT] = wl3[0]
    P[BL3_R, 0] = bl3[0]
    return jnp.asarray(P)


@jax.jit
def qrs_det_1_forward(x, packed_params):
    """x: (1, 1, INPUT_DIM) float32 (PyTorch NCL layout). Returns (1, 1, 1)."""
    # conv1 padding done here: jnp.pad fuses with the reshape/convert under jit,
    # so the kernel gets a ready, lane-aligned (1, 22) slab and 2 input DMAs total.
    xpad = jnp.pad(x.reshape(1, INPUT_DIM).astype(jnp.float32), ((0, 0), (P1, P1)))
    vmem = pl.BlockSpec(memory_space=pltpu.MemorySpace.VMEM)
    out = pl.pallas_call(
        _qrs_kernel,
        out_shape=jax.ShapeDtypeStruct((1, LIN3_OUT), jnp.float32),
        in_specs=[vmem, vmem],
        out_specs=vmem,
    )(xpad, packed_params)
    return out.reshape(1, 1, LIN3_OUT)


# ==================================================================================
# Batched throughput kernel: batch on LANES, convs folded into dense matrices at
# pack time -> 4 MXU matmuls + VPU reduce + sigmoid per batch tile.
# ==================================================================================
TB = 128   # batch tile (lanes per grid step); raise to 512-1024 for large workloads


def _qrs_batched_kernel(x_ref, w1t_ref, b1_ref, m2t_ref, b2_ref,
                        wl1_ref, bl1_ref, wl2_ref, bl2_ref, wl3t_ref, bl3_ref,
                        o_ref):
    f32 = jnp.float32
    x = x_ref[...]                                                        # (22, TB)
    c1 = jnp.dot(w1t_ref[...], x, preferred_element_type=f32) + b1_ref[...]
    c1 = jnp.maximum(c1, 0.0)                                             # (51, TB)
    c2 = jnp.dot(m2t_ref[...], c1, preferred_element_type=f32) + b2_ref[...]
    c2 = jnp.maximum(c2, 0.0)                                             # (162, TB)
    y1 = jnp.dot(wl1_ref[...], c2, preferred_element_type=f32) + bl1_ref[...]
    y1 = jnp.maximum(y1, 0.0)                                             # (16, TB)
    y2 = jnp.dot(wl2_ref[...], y1, preferred_element_type=f32) + bl2_ref[...]
    y2 = jnp.maximum(y2, 0.0)                                             # (12, TB)
    # lin3 on VPU (M=1 matmul would waste the MXU); output is lane-dense (1, TB)
    z = jnp.sum(wl3t_ref[...] * y2, axis=0, keepdims=True) + bl3_ref[...]
    o_ref[...] = jax.nn.sigmoid(z)


def pack_params_batched(params):
    """One-time folding of both convolutions into dense matrices (batch-on-lanes)."""
    w1, b1, w2, b2, wl1, bl1, wl2, bl2, wl3, bl3 = [np.asarray(p, np.float32)
                                                    for p in params]
    # conv1 as matmul: c1flat[o*L1+t] = sum_p W1T[o*L1+t, p] * xpad[p]
    W1T = np.zeros((C1_OUT * L1, XP), np.float32)
    for o in range(C1_OUT):
        for t in range(L1):
            W1T[o * L1 + t, t:t + K1] = w1[o, 0, :]
    b1c = np.repeat(b1, L1)[:, None]                                      # (51, 1)
    # conv2 as matmul: c2flat[o*L2+t] = sum_s M2T[o*L2+t, c*L1+s] * c1flat[c*L1+s]
    M2T = np.zeros((C2_OUT * L2, C1_OUT * L1), np.float32)
    for o in range(C2_OUT):
        for t in range(L2):
            for c in range(C1_OUT):
                for k in range(K2):
                    s = t + k - P2
                    if 0 <= s < L1:
                        M2T[o * L2 + t, c * L1 + s] = w2[o, c, k]
    b2c = np.repeat(b2, L2)[:, None]                                      # (162, 1)
    arrs = (W1T, b1c, M2T, b2c, wl1, bl1[:, None], wl2, bl2[:, None],
            wl3.T, bl3[:, None])
    return tuple(jnp.asarray(a) for a in arrs)


@jax.jit
def qrs_det_1_forward_batched(xb, bparams):
    """xb: (B, INPUT_DIM) float32, B a multiple of TB. Returns (B,) sigmoid scores."""
    w1t, b1c, m2t, b2c, wl1, bl1c, wl2, bl2c, wl3t, bl3c = bparams
    B = xb.shape[0]
    assert B % TB == 0
    # pad + transpose fuse under jit; batch goes on lanes (everything lane-dense).
    xpadT = jnp.pad(xb.astype(jnp.float32), ((0, 0), (P1, P1))).T         # (22, B)

    def full(a):
        # constant index_map -> each weight/bias is DMA'd once and stays resident
        return pl.BlockSpec(a.shape, lambda i: (0, 0))

    out = pl.pallas_call(
        _qrs_batched_kernel,
        out_shape=jax.ShapeDtypeStruct((1, B), jnp.float32),              # lane-dense
        grid=(B // TB,),
        in_specs=[pl.BlockSpec((XP, TB), lambda i: (0, i)),
                  full(w1t), full(b1c), full(m2t), full(b2c),
                  full(wl1), full(bl1c), full(wl2), full(bl2c),
                  full(wl3t), full(bl3c)],
        out_specs=pl.BlockSpec((1, TB), lambda i: (0, i)),
        compiler_params=pltpu.CompilerParams(
            dimension_semantics=("parallel",)),   # split batch over both TCs on v7x
    )(xpadT, w1t, b1c, m2t, b2c, wl1, bl1c, wl2, bl2c, wl3t, bl3c)
    return out[0]                                                          # (B,)


# ==================================================================================
# Reference + demo
# ==================================================================================
def _init_params(key):
    """Deterministic PyTorch-style uniform(-1/sqrt(fan_in), +1/sqrt(fan_in)) init."""
    ks = jax.random.split(key, 10)

    def u(k, shape, fan_in):
        b = 1.0 / np.sqrt(fan_in)
        return jax.random.uniform(k, shape, jnp.float32, -b, b)

    w1 = u(ks[0], (C1_OUT, C1_IN, K1), C1_IN * K1)
    b1 = u(ks[1], (C1_OUT,), C1_IN * K1)
    w2 = u(ks[2], (C2_OUT, C1_OUT, K2), C1_OUT * K2)
    b2 = u(ks[3], (C2_OUT,), C1_OUT * K2)
    wl1 = u(ks[4], (LIN1_OUT, LIN1_IN), LIN1_IN)
    bl1 = u(ks[5], (LIN1_OUT,), LIN1_IN)
    wl2 = u(ks[6], (LIN2_OUT, LIN1_OUT), LIN1_OUT)
    bl2 = u(ks[7], (LIN2_OUT,), LIN1_OUT)
    wl3 = u(ks[8], (LIN3_OUT, LIN2_OUT), LIN2_OUT)
    bl3 = u(ks[9], (LIN3_OUT,), LIN2_OUT)
    return (w1, b1, w2, b2, wl1, bl1, wl2, bl2, wl3, bl3)


def _reference(x, params):
    """Pure-JAX reference of the (inference-mode) forward pass."""
    w1, b1, w2, b2, wl1, bl1, wl2, bl2, wl3, bl3 = params
    xin = jnp.pad(x[0, 0], (P1, P1))
    c1 = jnp.stack([sum(w1[o, 0, k] * xin[k:k + L1] for k in range(K1)) + b1[o]
                    for o in range(C1_OUT)])
    c1 = jnp.maximum(c1, 0.0)
    c1p = jnp.pad(c1, ((0, 0), (P2, P2)))
    c2 = jnp.stack([sum(w2[o, c, k] * c1p[c, k:k + L2]
                        for c in range(C1_OUT) for k in range(K2)) + b2[o]
                    for o in range(C2_OUT)])
    c2 = jnp.maximum(c2, 0.0)
    flat = c2.reshape(-1)
    y1 = jnp.maximum(wl1 @ flat + bl1, 0.0)
    y2 = jnp.maximum(wl2 @ y1 + bl2, 0.0)
    return jax.nn.sigmoid(wl3 @ y2 + bl3).reshape(1, 1, 1)


if __name__ == "__main__":
    key = jax.random.PRNGKey(0)
    kx, kp, kb = jax.random.split(key, 3)
    params = _init_params(kp)

    # ---- single-sample (module-exact) path ----------------------------------------
    x = jax.random.normal(kx, (1, C1_IN, INPUT_DIM), jnp.float32)
    packed = pack_params(params)                     # one-time parameter re-layout
    out = jax.block_until_ready(qrs_det_1_forward(x, packed))
    ref = jax.block_until_ready(_reference(x, params))
    assert out.shape == (1, 1, 1)
    assert np.allclose(np.asarray(out), np.asarray(ref), rtol=1e-4, atol=1e-5)

    # ---- batched throughput path ---------------------------------------------------
    B = 256
    xb = jax.random.normal(kb, (B, INPUT_DIM), jnp.float32)
    bparams = pack_params_batched(params)            # one-time conv->matrix folding
    outb = jax.block_until_ready(qrs_det_1_forward_batched(xb, bparams))
    refb = jax.block_until_ready(
        jax.vmap(lambda xi: _reference(xi.reshape(1, 1, INPUT_DIM), params).reshape(()))(xb))
    assert outb.shape == (B,)
    # looser tolerance: MXU matmul passes may differ from the f32 reference ordering
    assert np.allclose(np.asarray(outb), np.asarray(refb), rtol=2e-2, atol=2e-2)

    print("KERNEL_OK")
</pallas_src>

<mosaic_0001>
module attributes {stable_mosaic.version = 11 : i64} {
  func.func @_qrs_kernel(%arg0: memref<1x22xf32, #tpu.memory_space<vmem>>, %arg1: memref<248x256xf32, #tpu.memory_space<vmem>>, %arg2: memref<1x1xf32, #tpu.memory_space<vmem>>) attributes {dimension_semantics = [], scalar_prefetch = 0 : i64, scratch_operands = 0 : i64, tpu.core_type = #tpu.core_type<tc>} {
    %c0 = arith.constant 0 : index
    %c0_0 = arith.constant 0 : index
    %0 = vector.load %arg1[%c0, %c0_0] : memref<248x256xf32, #tpu.memory_space<vmem>>, vector<3x6xf32>
    %c8 = arith.constant 8 : index
    %c0_1 = arith.constant 0 : index
    %1 = vector.load %arg1[%c8, %c0_1] : memref<248x256xf32, #tpu.memory_space<vmem>>, vector<3x1xf32>
    %c16 = arith.constant 16 : index
    %c0_2 = arith.constant 0 : index
    %2 = vector.load %arg1[%c16, %c0_2] : memref<248x256xf32, #tpu.memory_space<vmem>>, vector<9x12xf32>
    %c32 = arith.constant 32 : index
    %c0_3 = arith.constant 0 : index
    %3 = vector.load %arg1[%c32, %c0_3] : memref<248x256xf32, #tpu.memory_space<vmem>>, vector<9x1xf32>
    %c48 = arith.constant 48 : index
    %c0_4 = arith.constant 0 : index
    %4 = vector.load %arg1[%c48, %c0_4] : memref<248x256xf32, #tpu.memory_space<vmem>>, vector<144x18xf32>
    %c192 = arith.constant 192 : index
    %c0_5 = arith.constant 0 : index
    %5 = vector.load %arg1[%c192, %c0_5] : memref<248x256xf32, #tpu.memory_space<vmem>>, vector<16x1xf32>
    %c208 = arith.constant 208 : index
    %c0_6 = arith.constant 0 : index
    %6 = vector.load %arg1[%c208, %c0_6] : memref<248x256xf32, #tpu.memory_space<vmem>>, vector<16x12xf32>
    %c224 = arith.constant 224 : index
    %c0_7 = arith.constant 0 : index
    %7 = vector.load %arg1[%c224, %c0_7] : memref<248x256xf32, #tpu.memory_space<vmem>>, vector<1x12xf32>
    %c232 = arith.constant 232 : index
    %c0_8 = arith.constant 0 : index
    %8 = vector.load %arg1[%c232, %c0_8] : memref<248x256xf32, #tpu.memory_space<vmem>>, vector<1x12xf32>
    %c240 = arith.constant 240 : index
    %c0_9 = arith.constant 0 : index
    %9 = vector.load %arg1[%c240, %c0_9] : memref<248x256xf32, #tpu.memory_space<vmem>>, vector<1x1xf32>
    %c0_10 = arith.constant 0 : index
    %c0_11 = arith.constant 0 : index
    %10 = vector.load %arg0[%c0_10, %c0_11] : memref<1x22xf32, #tpu.memory_space<vmem>>, vector<1x22xf32>
    %cst = arith.constant 0.000000e+00 : f32
    %11 = vector.broadcast %cst : f32 to vector<3x17xf32>
    %12 = vector.extract_strided_slice %0 {offsets = [0, 0], sizes = [3, 1], strides = [1, 1]} : vector<3x6xf32> to vector<3x1xf32>
    %13 = vector.extract_strided_slice %10 {offsets = [0, 0], sizes = [1, 17], strides = [1, 1]} : vector<1x22xf32> to vector<1x17xf32>
    %14 = vector.broadcast %12 : vector<3x1xf32> to vector<3x17xf32>
    %15 = vector.broadcast %13 : vector<1x17xf32> to vector<3x17xf32>
    %16 = arith.mulf %14, %15 : vector<3x17xf32>
    %17 = arith.addf %11, %16 : vector<3x17xf32>
    %18 = vector.extract_strided_slice %0 {offsets = [0, 1], sizes = [3, 1], strides = [1, 1]} : vector<3x6xf32> to vector<3x1xf32>
    %19 = vector.extract_strided_slice %10 {offsets = [0, 1], sizes = [1, 17], strides = [1, 1]} : vector<1x22xf32> to vector<1x17xf32>
    %20 = vector.broadcast %18 : vector<3x1xf32> to vector<3x17xf32>
    %21 = vector.broadcast %19 : vector<1x17xf32> to vector<3x17xf32>
    %22 = arith.mulf %20, %21 : vector<3x17xf32>
    %23 = arith.addf %17, %22 : vector<3x17xf32>
    %24 = vector.extract_strided_slice %0 {offsets = [0, 2], sizes = [3, 1], strides = [1, 1]} : vector<3x6xf32> to vector<3x1xf32>
    %25 = vector.extract_strided_slice %10 {offsets = [0, 2], sizes = [1, 17], strides = [1, 1]} : vector<1x22xf32> to vector<1x17xf32>
    %26 = vector.broadcast %24 : vector<3x1xf32> to vector<3x17xf32>
    %27 = vector.broadcast %25 : vector<1x17xf32> to vector<3x17xf32>
    %28 = arith.mulf %26, %27 : vector<3x17xf32>
    %29 = arith.addf %23, %28 : vector<3x17xf32>
    %30 = vector.extract_strided_slice %0 {offsets = [0, 3], sizes = [3, 1], strides = [1, 1]} : vector<3x6xf32> to vector<3x1xf32>
    %31 = vector.extract_strided_slice %10 {offsets = [0, 3], sizes = [1, 17], strides = [1, 1]} : vector<1x22xf32> to vector<1x17xf32>
    %32 = vector.broadcast %30 : vector<3x1xf32> to vector<3x17xf32>
    %33 = vector.broadcast %31 : vector<1x17xf32> to vector<3x17xf32>
    %34 = arith.mulf %32, %33 : vector<3x17xf32>
    %35 = arith.addf %29, %34 : vector<3x17xf32>
    %36 = vector.extract_strided_slice %0 {offsets = [0, 4], sizes = [3, 1], strides = [1, 1]} : vector<3x6xf32> to vector<3x1xf32>
    %37 = vector.extract_strided_slice %10 {offsets = [0, 4], sizes = [1, 17], strides = [1, 1]} : vector<1x22xf32> to vector<1x17xf32>
    %38 = vector.broadcast %36 : vector<3x1xf32> to vector<3x17xf32>
    %39 = vector.broadcast %37 : vector<1x17xf32> to vector<3x17xf32>
    %40 = arith.mulf %38, %39 : vector<3x17xf32>
    %41 = arith.addf %35, %40 : vector<3x17xf32>
    %42 = vector.extract_strided_slice %0 {offsets = [0, 5], sizes = [3, 1], strides = [1, 1]} : vector<3x6xf32> to vector<3x1xf32>
    %43 = vector.extract_strided_slice %10 {offsets = [0, 5], sizes = [1, 17], strides = [1, 1]} : vector<1x22xf32> to vector<1x17xf32>
    %44 = vector.broadcast %42 : vector<3x1xf32> to vector<3x17xf32>
    %45 = vector.broadcast %43 : vector<1x17xf32> to vector<3x17xf32>
    %46 = arith.mulf %44, %45 : vector<3x17xf32>
    %47 = arith.addf %41, %46 : vector<3x17xf32>
    %48 = vector.broadcast %1 : vector<3x1xf32> to vector<3x17xf32>
    %49 = arith.addf %47, %48 : vector<3x17xf32>
    %cst_12 = arith.constant 0.000000e+00 : f32
    %50 = vector.broadcast %cst_12 : f32 to vector<3x17xf32>
    %51 = arith.maximumf %49, %50 : vector<3x17xf32>
    %cst_13 = arith.constant 0.000000e+00 : f32
    %52 = vector.broadcast %cst_13 : f32 to vector<3x2xf32>
    %53 = tpu.concatenate %52, %51, %52 in 1 : vector<3x2xf32>, vector<3x17xf32>, vector<3x2xf32> -> vector<3x21xf32>
    %cst_14 = arith.constant 0.000000e+00 : f32
    %54 = vector.broadcast %cst_14 : f32 to vector<9x18xf32>
    %55 = vector.extract_strided_slice %53 {offsets = [0, 0], sizes = [3, 18], strides = [1, 1]} : vector<3x21xf32> to vector<3x18xf32>
    %56 = vector.extract_strided_slice %2 {offsets = [0, 0], sizes = [9, 1], strides = [1, 1]} : vector<9x12xf32> to vector<9x1xf32>
    %57 = vector.extract_strided_slice %55 {offsets = [0, 0], sizes = [1, 18], strides = [1, 1]} : vector<3x18xf32> to vector<1x18xf32>
    %58 = vector.broadcast %56 : vector<9x1xf32> to vector<9x18xf32>
    %59 = vector.broadcast %57 : vector<1x18xf32> to vector<9x18xf32>
    %60 = arith.mulf %58, %59 : vector<9x18xf32>
    %61 = arith.addf %54, %60 : vector<9x18xf32>
    %62 = vector.extract_strided_slice %2 {offsets = [0, 4], sizes = [9, 1], strides = [1, 1]} : vector<9x12xf32> to vector<9x1xf32>
    %63 = vector.extract_strided_slice %55 {offsets = [1, 0], sizes = [1, 18], strides = [1, 1]} : vector<3x18xf32> to vector<1x18xf32>
    %64 = vector.broadcast %62 : vector<9x1xf32> to vector<9x18xf32>
    %65 = vector.broadcast %63 : vector<1x18xf32> to vector<9x18xf32>
    %66 = arith.mulf %64, %65 : vector<9x18xf32>
    %67 = arith.addf %61, %66 : vector<9x18xf32>
    %68 = vector.extract_strided_slice %2 {offsets = [0, 8], sizes = [9, 1], strides = [1, 1]} : vector<9x12xf32> to vector<9x1xf32>
    %69 = vector.extract_strided_slice %55 {offsets = [2, 0], sizes = [1, 18], strides = [1, 1]} : vector<3x18xf32> to vector<1x18xf32>
    %70 = vector.broadcast %68 : vector<9x1xf32> to vector<9x18xf32>
    %71 = vector.broadcast %69 : vector<1x18xf32> to vector<9x18xf32>
    %72 = arith.mulf %70, %71 : vector<9x18xf32>
    %73 = arith.addf %67, %72 : vector<9x18xf32>
    %74 = vector.extract_strided_slice %53 {offsets = [0, 1], sizes = [3, 18], strides = [1, 1]} : vector<3x21xf32> to vector<3x18xf32>
    %75 = vector.extract_strided_slice %2 {offsets = [0, 1], sizes = [9, 1], strides = [1, 1]} : vector<9x12xf32> to vector<9x1xf32>
    %76 = vector.extract_strided_slice %74 {offsets = [0, 0], sizes = [1, 18], strides = [1, 1]} : vector<3x18xf32> to vector<1x18xf32>
    %77 = vector.broadcast %75 : vector<9x1xf32> to vector<9x18xf32>
    %78 = vector.broadcast %76 : vector<1x18xf32> to vector<9x18xf32>
    %79 = arith.mulf %77, %78 : vector<9x18xf32>
    %80 = arith.addf %73, %79 : vector<9x18xf32>
    %81 = vector.extract_strided_slice %2 {offsets = [0, 5], sizes = [9, 1], strides = [1, 1]} : vector<9x12xf32> to vector<9x1xf32>
    %82 = vector.extract_strided_slice %74 {offsets = [1, 0], sizes = [1, 18], strides = [1, 1]} : vector<3x18xf32> to vector<1x18xf32>
    %83 = vector.broadcast %81 : vector<9x1xf32> to vector<9x18xf32>
    %84 = vector.broadcast %82 : vector<1x18xf32> to vector<9x18xf32>
    %85 = arith.mulf %83, %84 : vector<9x18xf32>
    %86 = arith.addf %80, %85 : vector<9x18xf32>
    %87 = vector.extract_strided_slice %2 {offsets = [0, 9], sizes = [9, 1], strides = [1, 1]} : vector<9x12xf32> to vector<9x1xf32>
    %88 = vector.extract_strided_slice %74 {offsets = [2, 0], sizes = [1, 18], strides = [1, 1]} : vector<3x18xf32> to vector<1x18xf32>
    %89 = vector.broadcast %87 : vector<9x1xf32> to vector<9x18xf32>
    %90 = vector.broadcast %88 : vector<1x18xf32> to vector<9x18xf32>
    %91 = arith.mulf %89, %90 : vector<9x18xf32>
    %92 = arith.addf %86, %91 : vector<9x18xf32>
    %93 = vector.extract_strided_slice %53 {offsets = [0, 2], sizes = [3, 18], strides = [1, 1]} : vector<3x21xf32> to vector<3x18xf32>
    %94 = vector.extract_strided_slice %2 {offsets = [0, 2], sizes = [9, 1], strides = [1, 1]} : vector<9x12xf32> to vector<9x1xf32>
    %95 = vector.extract_strided_slice %93 {offsets = [0, 0], sizes = [1, 18], strides = [1, 1]} : vector<3x18xf32> to vector<1x18xf32>
    %96 = vector.broadcast %94 : vector<9x1xf32> to vector<9x18xf32>
    %97 = vector.broadcast %95 : vector<1x18xf32> to vector<9x18xf32>
    %98 = arith.mulf %96, %97 : vector<9x18xf32>
    %99 = arith.addf %92, %98 : vector<9x18xf32>
    %100 = vector.extract_strided_slice %2 {offsets = [0, 6], sizes = [9, 1], strides = [1, 1]} : vector<9x12xf32> to vector<9x1xf32>
    %101 = vector.extract_strided_slice %93 {offsets = [1, 0], sizes = [1, 18], strides = [1, 1]} : vector<3x18xf32> to vector<1x18xf32>
    %102 = vector.broadcast %100 : vector<9x1xf32> to vector<9x18xf32>
    %103 = vector.broadcast %101 : vector<1x18xf32> to vector<9x18xf32>
    %104 = arith.mulf %102, %103 : vector<9x18xf32>
    %105 = arith.addf %99, %104 : vector<9x18xf32>
    %106 = vector.extract_strided_slice %2 {offsets = [0, 10], sizes = [9, 1], strides = [1, 1]} : vector<9x12xf32> to vector<9x1xf32>
    %107 = vector.extract_strided_slice %93 {offsets = [2, 0], sizes = [1, 18], strides = [1, 1]} : vector<3x18xf32> to vector<1x18xf32>
    %108 = vector.broadcast %106 : vector<9x1xf32> to vector<9x18xf32>
    %109 = vector.broadcast %107 : vector<1x18xf32> to vector<9x18xf32>
    %110 = arith.mulf %108, %109 : vector<9x18xf32>
    %111 = arith.addf %105, %110 : vector<9x18xf32>
    %112 = vector.extract_strided_slice %53 {offsets = [0, 3], sizes = [3, 18], strides = [1, 1]} : vector<3x21xf32> to vector<3x18xf32>
    %113 = vector.extract_strided_slice %2 {offsets = [0, 3], sizes = [9, 1], strides = [1, 1]} : vector<9x12xf32> to vector<9x1xf32>
    %114 = vector.extract_strided_slice %112 {offsets = [0, 0], sizes = [1, 18], strides = [1, 1]} : vector<3x18xf32> to vector<1x18xf32>
    %115 = vector.broadcast %113 : vector<9x1xf32> to vector<9x18xf32>
    %116 = vector.broadcast %114 : vector<1x18xf32> to vector<9x18xf32>
    %117 = arith.mulf %115, %116 : vector<9x18xf32>
    %118 = arith.addf %111, %117 : vector<9x18xf32>
    %119 = vector.extract_strided_slice %2 {offsets = [0, 7], sizes = [9, 1], strides = [1, 1]} : vector<9x12xf32> to vector<9x1xf32>
    %120 = vector.extract_strided_slice %112 {offsets = [1, 0], sizes = [1, 18], strides = [1, 1]} : vector<3x18xf32> to vector<1x18xf32>
    %121 = vector.broadcast %119 : vector<9x1xf32> to vector<9x18xf32>
    %122 = vector.broadcast %120 : vector<1x18xf32> to vector<9x18xf32>
    %123 = arith.mulf %121, %122 : vector<9x18xf32>
    %124 = arith.addf %118, %123 : vector<9x18xf32>
    %125 = vector.extract_strided_slice %2 {offsets = [0, 11], sizes = [9, 1], strides = [1, 1]} : vector<9x12xf32> to vector<9x1xf32>
    %126 = vector.extract_strided_slice %112 {offsets = [2, 0], sizes = [1, 18], strides = [1, 1]} : vector<3x18xf32> to vector<1x18xf32>
    %127 = vector.broadcast %125 : vector<9x1xf32> to vector<9x18xf32>
    %128 = vector.broadcast %126 : vector<1x18xf32> to vector<9x18xf32>
    %129 = arith.mulf %127, %128 : vector<9x18xf32>
    %130 = arith.addf %124, %129 : vector<9x18xf32>
    %131 = vector.broadcast %3 : vector<9x1xf32> to vector<9x18xf32>
    %132 = arith.addf %130, %131 : vector<9x18xf32>
    %cst_15 = arith.constant 0.000000e+00 : f32
    %133 = vector.broadcast %cst_15 : f32 to vector<9x18xf32>
    %134 = arith.maximumf %132, %133 : vector<9x18xf32>
    %cst_16 = arith.constant 0.000000e+00 : f32
    %135 = vector.broadcast %cst_16 : f32 to vector<16x18xf32>
    %136 = vector.extract_strided_slice %4 {offsets = [0, 0], sizes = [16, 18], strides = [1, 1]} : vector<144x18xf32> to vector<16x18xf32>
    %137 = vector.extract_strided_slice %134 {offsets = [0, 0], sizes = [1, 18], strides = [1, 1]} : vector<9x18xf32> to vector<1x18xf32>
    %138 = vector.broadcast %137 : vector<1x18xf32> to vector<16x18xf32>
    %139 = arith.mulf %136, %138 : vector<16x18xf32>
    %140 = arith.addf %135, %139 : vector<16x18xf32>
    %141 = vector.extract_strided_slice %4 {offsets = [16, 0], sizes = [16, 18], strides = [1, 1]} : vector<144x18xf32> to vector<16x18xf32>
    %142 = vector.extract_strided_slice %134 {offsets = [1, 0], sizes = [1, 18], strides = [1, 1]} : vector<9x18xf32> to vector<1x18xf32>
    %143 = vector.broadcast %142 : vector<1x18xf32> to vector<16x18xf32>
    %144 = arith.mulf %141, %143 : vector<16x18xf32>
    %145 = arith.addf %140, %144 : vector<16x18xf32>
    %146 = vector.extract_strided_slice %4 {offsets = [32, 0], sizes = [16, 18], strides = [1, 1]} : vector<144x18xf32> to vector<16x18xf32>
    %147 = vector.extract_strided_slice %134 {offsets = [2, 0], sizes = [1, 18], strides = [1, 1]} : vector<9x18xf32> to vector<1x18xf32>
    %148 = vector.broadcast %147 : vector<1x18xf32> to vector<16x18xf32>
    %149 = arith.mulf %146, %148 : vector<16x18xf32>
    %150 = arith.addf %145, %149 : vector<16x18xf32>
    %151 = vector.extract_strided_slice %4 {offsets = [48, 0], sizes = [16, 18], strides = [1, 1]} : vector<144x18xf32> to vector<16x18xf32>
    %152 = vector.extract_strided_slice %134 {offsets = [3, 0], sizes = [1, 18], strides = [1, 1]} : vector<9x18xf32> to vector<1x18xf32>
    %153 = vector.broadcast %152 : vector<1x18xf32> to vector<16x18xf32>
    %154 = arith.mulf %151, %153 : vector<16x18xf32>
    %155 = arith.addf %150, %154 : vector<16x18xf32>
    %156 = vector.extract_strided_slice %4 {offsets = [64, 0], sizes = [16, 18], strides = [1, 1]} : vector<144x18xf32> to vector<16x18xf32>
    %157 = vector.extract_strided_slice %134 {offsets = [4, 0], sizes = [1, 18], strides = [1, 1]} : vector<9x18xf32> to vector<1x18xf32>
    %158 = vector.broadcast %157 : vector<1x18xf32> to vector<16x18xf32>
    %159 = arith.mulf %156, %158 : vector<16x18xf32>
    %160 = arith.addf %155, %159 : vector<16x18xf32>
    %161 = vector.extract_strided_slice %4 {offsets = [80, 0], sizes = [16, 18], strides = [1, 1]} : vector<144x18xf32> to vector<16x18xf32>
    %162 = vector.extract_strided_slice %134 {offsets = [5, 0], sizes = [1, 18], strides = [1, 1]} : vector<9x18xf32> to vector<1x18xf32>
    %163 = vector.broadcast %162 : vector<1x18xf32> to vector<16x18xf32>
    %164 = arith.mulf %161, %163 : vector<16x18xf32>
    %165 = arith.addf %160, %164 : vector<16x18xf32>
    %166 = vector.extract_strided_slice %4 {offsets = [96, 0], sizes = [16, 18], strides = [1, 1]} : vector<144x18xf32> to vector<16x18xf32>
    %167 = vector.extract_strided_slice %134 {offsets = [6, 0], sizes = [1, 18], strides = [1, 1]} : vector<9x18xf32> to vector<1x18xf32>
    %168 = vector.broadcast %167 : vector<1x18xf32> to vector<16x18xf32>
    %169 = arith.mulf %166, %168 : vector<16x18xf32>
    %170 = arith.addf %165, %169 : vector<16x18xf32>
    %171 = vector.extract_strided_slice %4 {offsets = [112, 0], sizes = [16, 18], strides = [1, 1]} : vector<144x18xf32> to vector<16x18xf32>
    %172 = vector.extract_strided_slice %134 {offsets = [7, 0], sizes = [1, 18], strides = [1, 1]} : vector<9x18xf32> to vector<1x18xf32>
    %173 = vector.broadcast %172 : vector<1x18xf32> to vector<16x18xf32>
    %174 = arith.mulf %171, %173 : vector<16x18xf32>
    %175 = arith.addf %170, %174 : vector<16x18xf32>
    %176 = vector.extract_strided_slice %4 {offsets = [128, 0], sizes = [16, 18], strides = [1, 1]} : vector<144x18xf32> to vector<16x18xf32>
    %177 = vector.extract_strided_slice %134 {offsets = [8, 0], sizes = [1, 18], strides = [1, 1]} : vector<9x18xf32> to vector<1x18xf32>
    %178 = vector.broadcast %177 : vector<1x18xf32> to vector<16x18xf32>
    %179 = arith.mulf %176, %178 : vector<16x18xf32>
    %180 = arith.addf %175, %179 : vector<16x18xf32>
    %cst_17 = arith.constant dense<0.000000e+00> : vector<16xf32>
    %181 = vector.multi_reduction <add>, %180, %cst_17 [1] : vector<16x18xf32> to vector<16xf32>
    %182 = vector.shape_cast %181 : vector<16xf32> to vector<16x1xf32>
    %183 = arith.addf %182, %5 : vector<16x1xf32>
    %cst_18 = arith.constant 0.000000e+00 : f32
    %184 = vector.broadcast %cst_18 : f32 to vector<16x1xf32>
    %185 = arith.maximumf %183, %184 : vector<16x1xf32>
    %186 = vector.broadcast %185 : vector<16x1xf32> to vector<16x12xf32>
    %187 = arith.mulf %6, %186 : vector<16x12xf32>
    %cst_19 = arith.constant dense<0.000000e+00> : vector<12xf32>
    %188 = vector.multi_reduction <add>, %187, %cst_19 [0] : vector<16x12xf32> to vector<12xf32>
    %189 = vector.shape_cast %188 : vector<12xf32> to vector<1x12xf32>
    %190 = arith.addf %189, %7 : vector<1x12xf32>
    %cst_20 = arith.constant 0.000000e+00 : f32
    %191 = vector.broadcast %cst_20 : f32 to vector<1x12xf32>
    %192 = arith.maximumf %190, %191 : vector<1x12xf32>
    %193 = arith.mulf %8, %192 : vector<1x12xf32>
    %cst_21 = arith.constant dense<0.000000e+00> : vector<1xf32>
    %194 = vector.multi_reduction <add>, %193, %cst_21 [1] : vector<1x12xf32> to vector<1xf32>
    %195 = vector.shape_cast %194 : vector<1xf32> to vector<1x1xf32>
    %196 = arith.addf %195, %9 : vector<1x1xf32>
    %197 = arith.negf %196 : vector<1x1xf32>
    %198 = math.exp %197 : vector<1x1xf32>
    %cst_22 = arith.constant 1.000000e+00 : f32
    %199 = vector.broadcast %cst_22 : f32 to vector<1x1xf32>
    %200 = arith.addf %199, %198 : vector<1x1xf32>
    %201 = arith.divf %199, %200 : vector<1x1xf32>
    %c0_23 = arith.constant 0 : index
    %c0_24 = arith.constant 0 : index
    %202 = vector.load %arg2[%c0_23, %c0_24] : memref<1x1xf32, #tpu.memory_space<vmem>>, vector<1x1xf32>
    tpu.vector_store %arg2[%c0_23, %c0_24], %201 {strides = array<i32>} : memref<1x1xf32, #tpu.memory_space<vmem>>, vector<1x1xf32>,
    return
  }
}

</mosaic_0001>

<bundles_post_ra>
// kernel: qrs_det_1_forward.1
= control target key start
LH: loop header
LB: loop body
LE: loop exit
PB: predicated region body
PF: predicated region fallthrough
CT: control target
= control target key end

     0   :  { %7 = vsyncpa [#allocation3], 0  ;;  %s773_s0 = inlined_call_operand.vmem [shape: f32[1,22], index: 0, kind: input, shape index: {}]   ;;  %s774_s1 = inlined_call_operand.hbm [shape: f32[248,256], index: 1, kind: input, shape index: {}]   ;;  %s775_s2 = inlined_call_operand.hbm [shape: f32[1,1], index: 2, kind: output, shape index: {}]  }
   0x1   :  { %8 = vsyncpa [#allocation4], 0  ;;  %s617_s9 = smov [#allocation2]  }
   0x2   :  { %s16_s10 = sshll.u32 %s617_s9, 4  ;;  %s17_s10 = int_to_ptr.vmem [resolvable:$true] %s16_s10 }
   0x3   :  { %s581_s11 = scalar_lea.vmem %s17_s10, 7936  ;;  %p586_p1 = scmp.lt.s32.totalorder %s17_s10, %s17_s10 }
   0x4   :  { %p582_p0 = scmp.ne.s32.totalorder %s17_s10, %s581_s11  ;;  %p587_p2 = scmp.lt.s32.totalorder %s581_s11, %s581_s11 }
   0x6   :  { %p588_p3 = por %p587_p2, %p586_p1 }
   0x8   :  { %p589_p4 = pnand %p588_p3, %p582_p0 }
   0xa   :  { %592 = shalt.err (!%p589_p4)
}
   0xb   :  { %s618_s12 = smov 256   ;;  %s619_s13 = smov 16  }
   0xc   :  { %22 = dma.hbm_to_vmem [thread:$0]  %s774_s1, 7936, %s17_s10, [#allocation3], %s618_s12, %s618_s12, %s619_s13  }
   0xd   :  { %613 = dma.done.wait [#allocation3], 7936  }
   0xe   :  { %614 = vsyncadd [#allocation3], 4294959360  ;;  %v620_v0 = vmov 1   ;;  %v621_v1 = vmov 3   ;;  %v26_v2 = vld [vmem:[#allocation2] sm:$0x7]  ;;  %v146_v46 = vlaneseq }
   0xf   :  { %539 = vset.pattern.permute.xlu0 %v620_v0  ;;  %541 = vset.pattern.permute.xlu1 %v621_v1  ;;  %v622_v3 = vmov 2   ;;  %v623_v4 = vmov 4   ;;  %v624_v5 = vmov 5   ;;  %v625_v6 = vmov 0   ;;  %v515_v7 = vld [vmem:[%s773_s0] ss:$0 sm:$0xff] }
  0x10   :  { %72 = vperm.xlu0 %539, %v26_v2   ;;  %92 = vperm.xlu1 %541, %v26_v2   ;;  %s626_s17 = smov 127   ;;  %s627_s18 = smov 125   ;;  %v27_v16 = vld [vmem:[#allocation2 + $0x10] sm:$0x7]  ;;  %v671_v17 = vld [vmem:[#allocation2 + $0x20] sm:$0xff]  ;;  %v631_v20 = vmov 9  }
  0x11   :  { %s628_s19 = smov 126   ;;  %s629_s20 = smov 124   ;;  %v632_v21 = vmov 10   ;;  %v633_v22 = vmov 7   ;;  %v29_v23 = vld [vmem:[#allocation2 + $0x30] sm:$0x1] }
  0x12   :  { %s630_s0 = smov 123   ;;  %v634_v24 = vmov 6   ;;  %v635_v25 = vmov 11   ;;  %v636_v26 = vmov 8   ;;  %v30_v27 = vld [vmem:[#allocation2 + $0x40] sm:$0xff]  ;;  %s637_s21 = smov 2  }
  0x13   :  { %v696_v49 = vshrl.u32 %v146_v46, 7  ;;  %vm132_vm0 = vcmask 15360   ;;  %vm134_vm1 = vcmask 154624   ;;  %vm452_vm2 = vcmask 146432   ;;  %s638_s22 = smov [#allocation5]  }
  0x14   :  { %540 = vset.pattern.permute.xlu0 %v622_v3  ;;  %542 = vset.pattern.permute.xlu1 %v623_v4  ;;  %vm475_vm3 = vcmask 97280   ;;  %s506_s23 = sshll.u32 %s638_s22, 4  ;;  %vm498_vm4 = vcmask 0   ;;  %s507_s23 = int_to_ptr.vmem [resolvable:$true] %s506_s23 }
  0x15   :  { %82 = vperm.xlu0 %540, %v26_v2   ;;  %102 = vperm.xlu1 %542, %v26_v2   ;;  %v699_v51 = vsub.s32 0, %v696_v49  ;;  %v180_v52 = vsub.s32 2, %v696_v49  ;;  %v164_v54 = vsub.s32 1, %v696_v49  ;;  %s593_s24 = scalar_lea.vmem %s507_s23, 16  ;;  %s597_s25 = scalar_lea.vmem %s507_s23, 32 }
  0x16   :  { %p594_p5 = scmp.ne.s32.totalorder %s507_s23, %s593_s24  ;;  %p598_p6 = scmp.lt.s32.totalorder %s507_s23, %s507_s23 }
  0x17   :  { %p599_p7 = scmp.lt.s32.totalorder %s597_s25, %s593_s24 }
  0x19   :  { %543 = vset.pattern.permute.xlu1 %v624_v5  ;;  %544 = vset.pattern.permute.xlu0 %v625_v6  ;;  %p600_p8 = por %p599_p7, %p598_p6 }
  0x1a   :  { %112 = vperm.xlu1 %543, %v26_v2   ;;  %60 = vperm.xlu0 %544, %v26_v2  }
  0x1b   :  { %p601_p9 = pnand %p600_p8, %p594_p5 }
  0x1e   :  { %545 = vset.pattern.permute.xlu1 %v625_v6  ;;  %546 = vset.pattern.permute.xlu0 %v620_v0 }
  0x8b   :  { %v73_v8 = vpop.permute.xlu0 %72  ;;  %v93_v9 = vpop.permute.xlu1 %92 }
  0x8c   :  { %v75_v10 = vmul.f32 %v515_v7, %v73_v8  ;;  %v95_v11 = vmul.f32 %v515_v7, %v93_v9 }
  0x8e   :  { %77 = vrot.lane.b32.xlu1 %v75_v10, %s626_s17  ;;  %97 = vrot.lane.b32.xlu0 %v95_v11, %s627_s18 }
  0x90   :  { %v83_v12 = vpop.permute.xlu0 %82  ;;  %v103_v13 = vpop.permute.xlu1 %102 }
  0x91   :  { %v85_v14 = vmul.f32 %v515_v7, %v83_v12  ;;  %v105_v15 = vmul.f32 %v515_v7, %v103_v13 }
  0x93   :  { %87 = vrot.lane.b32.xlu1 %v85_v14, %s628_s19  ;;  %107 = vrot.lane.b32.xlu0 %v105_v15, %s629_s20 }
  0x95   :  { %v113_v18 = vpop.permute.xlu1 %112  ;;  %v61_v28 = vpop.permute.xlu0 %60 }
  0x96   :  { %v115_v19 = vmul.f32 %v515_v7, %v113_v18  ;;  %v69_v30 = vmul.f32 %v515_v7, %v61_v28 }
  0x97   :  { %123 = vperm.xlu1 %545, %v27_v16   ;;  %187 = vperm.xlu0 %546, %v671_v17  }
  0x9b   :  { %117 = vrot.lane.b32.xlu1 %v115_v19, %s630_s0  ;;  %548 = vset.pattern.permute.xlu0 %v631_v20 }
  0x9c   :  { %227 = vperm.xlu0 %548, %v671_v17   ;;  %547 = vset.pattern.permute.xlu1 %v624_v5 }
  0x9f   :  { %207 = vperm.xlu1 %547, %v671_v17  }
  0xa0   :  { %551 = vset.pattern.permute.xlu0 %v632_v21 }
  0xa1   :  { %287 = vperm.xlu0 %551, %v671_v17  }
  0xa3   :  { %549 = vset.pattern.permute.xlu1 %v622_v3 }
  0xa4   :  { %247 = vperm.xlu1 %549, %v671_v17  }
  0xa5   :  { %554 = vset.pattern.permute.xlu0 %v633_v22 }
  0xa6   :  { %327 = vperm.xlu0 %554, %v671_v17  }
  0xa8   :  { %550 = vset.pattern.permute.xlu1 %v634_v24 }
  0xa9   :  { %267 = vperm.xlu1 %550, %v671_v17  }
  0xaa   :  { %557 = vset.pattern.permute.xlu0 %v631_v20 }
  0xab   :  { %231 = vperm.xlu0 %557, %v29_v23  }
  0xad   :  { %552 = vset.pattern.permute.xlu1 %v621_v1 }
  0xae   :  { %307 = vperm.xlu1 %552, %v671_v17  }
  0xaf   :  { %560 = vset.pattern.permute.xlu0 %v632_v21 }
  0xb0   :  { %291 = vperm.xlu0 %560, %v29_v23  }
  0xb2   :  { %553 = vset.pattern.permute.xlu1 %v620_v0 }
  0xb4   :  { %563 = vset.pattern.permute.xlu0 %v635_v25 }
  0xb5   :  { %351 = vperm.xlu0 %563, %v29_v23  }
  0xb9   :  { %566 = vset.pattern.permute.xlu0 %v636_v26 }
  0xba   :  { %171 = vperm.xlu0 %566, %v671_v17  }
  0xbe   :  { %175 = vperm.xlu0 %566, %v29_v23  }
  0xc2   :  { %567 = vset.pattern.permute.xlu0 %v625_v6 }
  0xc3   :  { %143 = vperm.xlu0 %567, %v29_v23  }
  0xc7   :  { %368 = vperm.xlu0 %567, %v30_v27   ;;  %v31_v27 = vld [vmem:[#allocation2 + $0x50] sm:$0x1] }
 0x100   :  { %v78_v29 = vpop.permute.xlu1 %77  ;;  %v98_v33 = vpop.permute.xlu0 %97 }
 0x101   :  { %v80_v32 = vadd.f32 %v78_v29, %v69_v30 }
 0x105   :  { %v88_v31 = vpop.permute.xlu1 %87  ;;  %v108_v36 = vpop.permute.xlu0 %107 }
 0x106   :  { %v90_v34 = vadd.f32 %v88_v31, %v80_v32 }
 0x108   :  { %v100_v35 = vadd.f32 %v98_v33, %v90_v34 }
 0x10a   :  { %v110_v38 = vadd.f32 %v108_v36, %v100_v35 }
 0x112   :  { %v124_v37 = vpop.permute.xlu1 %123  ;;  %v188_v47 = vpop.permute.xlu0 %187 }
 0x116   :  { %v118_v39 = vpop.permute.xlu1 %117 }
 0x117   :  { %v120_v40 = vadd.f32 %v118_v39, %v110_v38  ;;  %v228_v50 = vpop.permute.xlu0 %227 }
 0x119   :  { %v126_v41 = vadd.f32 %v124_v37, %v120_v40 }
 0x11a   :  { %v208_v43 = vpop.permute.xlu1 %207 }
 0x11b   :  { %v127_v42 = vmax.f32 %v126_v41, 0.0 }
 0x11c   :  { %v288_v59 = vpop.permute.xlu0 %287 }
 0x11d   :  { %129 = vrot.lane.b32.xlu1 %v127_v42, %s637_s21 }
 0x11f   :  { %v248_v44 = vpop.permute.xlu1 %247 }
 0x121   :  { %191 = vperm.xlu1 %553, %v29_v23   ;;  %v328_v2 = vpop.permute.xlu0 %327 }
 0x124   :  { %v268_v45 = vpop.permute.xlu1 %267 }
 0x125   :  { %555 = vset.pattern.permute.xlu1 %v624_v5 }
 0x126   :  { %211 = vperm.xlu1 %555, %v29_v23   ;;  %v232_v7 = vpop.permute.xlu0 %231 }
 0x129   :  { %v308_v48 = vpop.permute.xlu1 %307 }
 0x12a   :  { %556 = vset.pattern.permute.xlu1 %v635_v25 }
 0x12b   :  { %347 = vperm.xlu1 %556, %v671_v17   ;;  %v292_v13 = vpop.permute.xlu0 %291 }
 0x12f   :  { %558 = vset.pattern.permute.xlu1 %v622_v3 }
 0x130   :  { %251 = vperm.xlu1 %558, %v29_v23  }
 0x134   :  { %559 = vset.pattern.permute.xlu1 %v634_v24 }
 0x135   :  { %271 = vperm.xlu1 %559, %v29_v23  }
 0x139   :  { %561 = vset.pattern.permute.xlu1 %v621_v1 }
 0x13a   :  { %311 = vperm.xlu1 %561, %v29_v23  }
 0x13e   :  { %562 = vset.pattern.permute.xlu1 %v633_v22 }
 0x13f   :  { %331 = vperm.xlu1 %562, %v29_v23  }
 0x143   :  { %564 = vset.pattern.permute.xlu1 %v625_v6 }
 0x144   :  { %138 = vperm.xlu1 %564, %v671_v17  }
 0x148   :  { %565 = vset.pattern.permute.xlu1 %v623_v4 }
 0x149   :  { %155 = vperm.xlu1 %565, %v671_v17   ;;  %v352_v17 = vpop.permute.xlu0 %351 }
 0x14d   :  { %159 = vperm.xlu1 %565, %v29_v23   ;;  %v172_v22 = vpop.permute.xlu0 %171 }
 0x151   :  { %568 = vset.pattern.permute.xlu1 %v625_v6  ;;  %v176_v28 = vpop.permute.xlu0 %175 }
 0x155   :  { %v144_v33 = vpop.permute.xlu0 %143 }
 0x18f   :  { %v130_v53 = vpop.permute.xlu1 %129 }
 0x190   :  { %v133_v55 = vsel %vm132_vm0, 0.0, %v130_v53 }
 0x191   :  { %v135_v56 = vsel %vm134_vm1, %v133_v55, 0.0  ;;  %v369_v55 = vpop.permute.xlu0 %368 }
 0x192   :  { %v704_v57 = vrot.slane %v135_v56, %v699_v51  ;;  %v708_v58 = vrot.slane %v135_v56, %v180_v52  ;;  %v165_v60 = vrot.slane %v135_v56, %v164_v54 }
 0x194   :  { %v194_v61 = vmul.f32 %v188_v47, %v704_v57  ;;  %v294_v62 = vmul.f32 %v288_v59, %v708_v58  ;;  %v214_v63 = vmul.f32 %v208_v43, %v165_v60  ;;  %v234_v1 = vmul.f32 %v228_v50, %v708_v58 }
 0x195   :  { %v254_v3 = vmul.f32 %v248_v44, %v704_v57  ;;  %v274_v6 = vmul.f32 %v268_v45, %v165_v60  ;;  %v235_v9 = vmul.f32 %v232_v7, %v708_v58  ;;  %v314_v10 = vmul.f32 %v308_v48, %v704_v57 }
 0x196   :  { %198 = vrot.lane.b32.xlu1 %v194_v61, %s626_s17  ;;  %298 = vrot.lane.b32.xlu0 %v294_v62, %s628_s19  ;;  %v334_v15 = vmul.f32 %v328_v2, %v165_v60  ;;  %v295_v25 = vmul.f32 %v292_v13, %v708_v58  ;;  %v355_v30 = vmul.f32 %v352_v17, %v708_v58  ;;  %v406_v17 = vsub.s32 3, %v696_v49 }
 0x197   :  { %v182_v35 = vmul.f32 %v708_v58, %v172_v22  ;;  %v151_v37 = vmul.f32 %v704_v57, %v144_v33  ;;  %v183_v40 = vmul.f32 %v708_v58, %v176_v28  ;;  %v34_v22 = vld [vmem:[#allocation2 + $0x80] sm:$0xff] }
 0x19a   :  { %218 = vrot.lane.b32.xlu1 %v214_v63, %s626_s17 }
 0x19c   :  { %v192_v0 = vpop.permute.xlu1 %191 }
 0x19d   :  { %v195_v12 = vmul.f32 %v192_v0, %v704_v57 }
 0x19e   :  { %238 = vrot.lane.b32.xlu1 %v234_v1, %s626_s17 }
 0x1a1   :  { %v212_v4 = vpop.permute.xlu1 %211 }
 0x1a2   :  { %v215_v5 = vmul.f32 %v212_v4, %v165_v60  ;;  %258 = vrot.lane.b32.xlu1 %v254_v3, %s628_s19 }
 0x1a4   :  { %220 = vrot.lane.b32.xlu0 %v215_v5, %s626_s17 }
 0x1a6   :  { %v348_v8 = vpop.permute.xlu1 %347  ;;  %278 = vrot.lane.b32.xlu1 %v274_v6, %s628_s19 }
 0x1a7   :  { %v354_v18 = vmul.f32 %v348_v8, %v708_v58 }
 0x1a8   :  { %240 = vrot.lane.b32.xlu0 %v235_v9, %s626_s17 }
 0x1aa   :  { %318 = vrot.lane.b32.xlu1 %v314_v10, %s627_s18 }
 0x1ab   :  { %v252_v11 = vpop.permute.xlu1 %251 }
 0x1ac   :  { %v255_v21 = vmul.f32 %v252_v11, %v704_v57  ;;  %v33_v11 = vld [vmem:[#allocation2 + $0x70] sm:$0xff] }
 0x1ae   :  { %200 = vrot.lane.b32.xlu1 %v195_v12, %s626_s17  ;;  %v35_v12 = vld [vmem:[#allocation2 + $0x90] sm:$0xff] }
 0x1b0   :  { %v272_v14 = vpop.permute.xlu1 %271 }
 0x1b1   :  { %v275_v16 = vmul.f32 %v272_v14, %v165_v60 }
 0x1b2   :  { %338 = vrot.lane.b32.xlu1 %v334_v15, %s627_s18 }
 0x1b3   :  { %280 = vrot.lane.b32.xlu0 %v275_v16, %s628_s19 }
 0x1b5   :  { %v312_v19 = vpop.permute.xlu1 %311 }
 0x1b6   :  { %v315_v20 = vmul.f32 %v312_v19, %v704_v57  ;;  %358 = vrot.lane.b32.xlu1 %v354_v18, %s627_s18  ;;  %v32_v18 = vld [vmem:[#allocation2 + $0x60] sm:$0xff]  ;;  %v37_v19 = vld [vmem:[#allocation2 + $0xb0] sm:$0xff] }
 0x1b8   :  { %320 = vrot.lane.b32.xlu0 %v315_v20, %s627_s18 }
 0x1ba   :  { %v332_v23 = vpop.permute.xlu1 %331  ;;  %260 = vrot.lane.b32.xlu1 %v255_v21, %s628_s19 }
 0x1bb   :  { %v335_v24 = vmul.f32 %v332_v23, %v165_v60 }
 0x1bd   :  { %340 = vrot.lane.b32.xlu0 %v335_v24, %s627_s18 }
 0x1be   :  { %300 = vrot.lane.b32.xlu1 %v295_v25, %s628_s19  ;;  %v414_v25 = vsub.s32 4, %v696_v49 }
 0x1bf   :  { %v139_v26 = vpop.permute.xlu1 %138 }
 0x1c0   :  { %v150_v31 = vmul.f32 %v704_v57, %v139_v26  ;;  %v36_v26 = vld [vmem:[#allocation2 + $0xa0] sm:$0xff] }
 0x1c2   :  { %373 = vperm.xlu1 %568, %v31_v27  }
 0x1c4   :  { %v156_v29 = vpop.permute.xlu1 %155 }
 0x1c5   :  { %v166_v32 = vmul.f32 %v165_v60, %v156_v29 }
 0x1c6   :  { %360 = vrot.lane.b32.xlu1 %v355_v30, %s627_s18 }
 0x1c7   :  { %v168_v34 = vadd.f32 %v166_v32, %v150_v31  ;;  %v38_v32 = vld [vmem:[#allocation2 + $0xc0] sm:$0xff] }
 0x1c8   :  { %v160_v36 = vpop.permute.xlu1 %159 }
 0x1c9   :  { %v167_v38 = vmul.f32 %v165_v60, %v160_v36  ;;  %v184_v39 = vadd.f32 %v182_v35, %v168_v34 }
 0x1cb   :  { %v169_v41 = vadd.f32 %v167_v38, %v151_v37  ;;  %v422_v37 = vsub.s32 5, %v696_v49 }
 0x1cd   :  { %v185_v42 = vadd.f32 %v183_v40, %v169_v41 }
 0x208   :  { %v199_v43 = vpop.permute.xlu1 %198  ;;  %v299_v62 = vpop.permute.xlu0 %298 }
 0x209   :  { %v204_v47 = vadd.f32 %v199_v43, %v184_v39  ;;  %v41_v43 = vld [vmem:[#allocation2 + $0xf0] sm:$0xff] }
 0x20c   :  { %v219_v44 = vpop.permute.xlu1 %218 }
 0x20d   :  { %v224_v48 = vadd.f32 %v219_v44, %v204_v47  ;;  %v40_v44 = vld [vmem:[#allocation2 + $0xe0] sm:$0xff]  ;;  %v430_v47 = vsub.s32 6, %v696_v49 }
 0x210   :  { %v239_v45 = vpop.permute.xlu1 %238 }
 0x211   :  { %v244_v53 = vadd.f32 %v239_v45, %v224_v48 }
 0x214   :  { %v259_v46 = vpop.permute.xlu1 %258 }
 0x215   :  { %v264_v56 = vadd.f32 %v259_v46, %v244_v53 }
 0x216   :  { %v221_v1 = vpop.permute.xlu0 %220 }
 0x218   :  { %v279_v50 = vpop.permute.xlu1 %278 }
 0x219   :  { %v284_v61 = vadd.f32 %v279_v50, %v264_v56 }
 0x21a   :  { %v241_v7 = vpop.permute.xlu0 %240 }
 0x21b   :  { %v304_v60 = vadd.f32 %v299_v62, %v284_v61  ;;  %v42_v61 = vld [vmem:[#allocation2 + $0x100] sm:$0xff] }
 0x21c   :  { %v319_v59 = vpop.permute.xlu1 %318 }
 0x21d   :  { %v324_v0 = vadd.f32 %v319_v59, %v304_v60  ;;  %v43_v59 = vld [vmem:[#allocation2 + $0x110] sm:$0xff] }
 0x220   :  { %v201_v57 = vpop.permute.xlu1 %200 }
 0x221   :  { %v205_v58 = vadd.f32 %v201_v57, %v185_v42 }
 0x223   :  { %v225_v5 = vadd.f32 %v221_v1, %v205_v58 }
 0x224   :  { %v339_v63 = vpop.permute.xlu1 %338 }
 0x225   :  { %v344_v2 = vadd.f32 %v339_v63, %v324_v0  ;;  %v245_v10 = vadd.f32 %v241_v7, %v225_v5  ;;  %v281_v23 = vpop.permute.xlu0 %280  ;;  %v438_v63 = vsub.s32 7, %v696_v49  ;;  %v44_v5 = vld [vmem:[#allocation2 + $0x120] sm:$0xff] }
 0x228   :  { %v359_v3 = vpop.permute.xlu1 %358 }
 0x229   :  { %v364_v4 = vadd.f32 %v359_v3, %v344_v2 }
 0x22a   :  { %v321_v42 = vpop.permute.xlu0 %320 }
 0x22b   :  { %v376_v6 = vadd.f32 %v369_v55, %v364_v4  ;;  %v45_v4 = vld [vmem:[#allocation2 + $0x130] sm:$0xff] }
 0x22c   :  { %v261_v9 = vpop.permute.xlu1 %260 }
 0x22d   :  { %v746_v8 = vmax.f32 %v376_v6, 0.0  ;;  %v265_v15 = vadd.f32 %v261_v9, %v245_v10 }
 0x22f   :  { %v383_v13 = vrot.slane %v746_v8, %v699_v51  ;;  %v391_v14 = vrot.slane %v746_v8, %v164_v54  ;;  %v399_v16 = vrot.slane %v746_v8, %v180_v52  ;;  %v285_v28 = vadd.f32 %v281_v23, %v265_v15  ;;  %v39_v52 = vld [vmem:[#allocation2 + $0xd0] sm:$0xff]  ;;  %v341_v60 = vpop.permute.xlu0 %340  ;;  %v46_v15 = vld [vmem:[#allocation2 + $0x140] sm:$0xff] }
 0x230   :  { %v407_v29 = vrot.slane %v746_v8, %v406_v17  ;;  %v301_v31 = vpop.permute.xlu1 %300  ;;  %v415_v36 = vrot.slane %v746_v8, %v414_v25  ;;  %v423_v53 = vrot.slane %v746_v8, %v422_v37  ;;  %v431_v1 = vrot.slane %v746_v8, %v430_v47 }
 0x231   :  { %v385_v20 = vmul.f32 %v383_v13, %v33_v11  ;;  %v393_v21 = vmul.f32 %v391_v14, %v35_v12  ;;  %v384_v27 = vmul.f32 %v383_v13, %v32_v18  ;;  %v401_v54 = vmul.f32 %v399_v16, %v37_v19  ;;  %v49_v18 = vld [vmem:[#allocation2 + $0x170] sm:$0xff]  ;;  %v48_v19 = vld [vmem:[#allocation2 + $0x160] sm:$0xff] }
 0x232   :  { %v392_v30 = vmul.f32 %v391_v14, %v34_v22  ;;  %v400_v35 = vmul.f32 %v399_v16, %v36_v26  ;;  %v305_v38 = vadd.f32 %v301_v31, %v285_v28  ;;  %v409_v39 = vmul.f32 %v407_v29, %v39_v52  ;;  %v47_v14 = vld [vmem:[#allocation2 + $0x150] sm:$0xff] }
 0x233   :  { %v395_v24 = vadd.f32 %v393_v21, %v385_v20  ;;  %v408_v41 = vmul.f32 %v407_v29, %v38_v32  ;;  %v417_v50 = vmul.f32 %v415_v36, %v41_v43  ;;  %v416_v55 = vmul.f32 %v415_v36, %v40_v44  ;;  %v51_v29 = vld [vmem:[#allocation2 + $0x190] sm:$0xff]  ;;  %v52_v36 = vld [vmem:[#allocation2 + $0x1a0] sm:$0xff] }
 0x234   :  { %v394_v34 = vadd.f32 %v392_v30, %v384_v27  ;;  %v325_v48 = vadd.f32 %v321_v42, %v305_v38  ;;  %v425_v58 = vmul.f32 %v423_v53, %v43_v59  ;;  %v424_v2 = vmul.f32 %v423_v53, %v42_v61  ;;  %v50_v30 = vld [vmem:[#allocation2 + $0x180] sm:$0xff] }
 0x235   :  { %v403_v33 = vadd.f32 %v401_v54, %v395_v24  ;;  %v433_v11 = vmul.f32 %v431_v1, %v45_v4  ;;  %v439_v12 = vrot.slane %v746_v8, %v438_v63  ;;  %v432_v13 = vmul.f32 %v431_v1, %v44_v5 }
 0x236   :  { %v402_v40 = vadd.f32 %v400_v35, %v394_v34  ;;  %v345_v0 = vadd.f32 %v341_v60, %v325_v48  ;;  %v53_v35 = vld [vmem:[#allocation2 + $0x1b0] sm:$0xff] }
 0x237   :  { %v411_v45 = vadd.f32 %v409_v39, %v403_v33  ;;  %v441_v21 = vmul.f32 %v439_v12, %v47_v14  ;;  %v440_v22 = vmul.f32 %v439_v12, %v46_v15 }
 0x238   :  { %v410_v46 = vadd.f32 %v408_v41, %v402_v40 }
 0x239   :  { %v419_v62 = vadd.f32 %v417_v50, %v411_v45  ;;  %v54_v50 = vld [vmem:[#allocation2 + $0x1c0] ss:$0 sm:$0xff] }
 0x23a   :  { %v418_v57 = vadd.f32 %v416_v55, %v410_v46 }
 0x23b   :  { %v427_v7 = vadd.f32 %v425_v58, %v419_v62 }
 0x23c   :  { %v426_v9 = vadd.f32 %v424_v2, %v418_v57  ;;  %v56_v57 = vld [vmem:[#allocation2 + $0x1e0] ss:$0 sm:$0xff] }
 0x23d   :  { %v374_v56 = vpop.permute.xlu1 %373  ;;  %v435_v49 = vadd.f32 %v433_v11, %v427_v7 }
 0x23e   :  { %v434_v17 = vadd.f32 %v432_v13, %v426_v9 }
 0x23f   :  { %v443_v23 = vadd.f32 %v441_v21, %v435_v49 }
 0x240   :  { %v442_v25 = vadd.f32 %v440_v22, %v434_v17 }
 0x241   :  { %v361_v3 = vpop.permute.xlu1 %360 }
 0x242   :  { %v365_v6 = vadd.f32 %v361_v3, %v345_v0 }
 0x244   :  { %v377_v10 = vadd.f32 %v374_v56, %v365_v6  ;;  %v55_v56 = vld [vmem:[#allocation2 + $0x1d0] ss:$0 sm:$0xff] }
 0x246   :  { %v379_v16 = vmax.f32 %v377_v10, 0.0 }
 0x248   :  { %v447_v20 = vrot.slane %v379_v16, %v699_v51 }
 0x24a   :  { %v449_v24 = vmul.f32 %v447_v20, %v49_v18  ;;  %v448_v26 = vmul.f32 %v447_v20, %v48_v19 }
 0x24c   :  { %v451_v27 = vadd.f32 %v449_v24, %v443_v23  ;;  %v450_v28 = vadd.f32 %v448_v26, %v442_v25 }
 0x24e   :  { %v456_v8 = vsel %vm452_vm2, %v451_v27, 0.0  ;;  %v453_v54 = vsel %vm452_vm2, %v450_v28, 0.0 }
 0x24f   :  { %457 = vadd.xlane.f32.xlu1 %v456_v8  ;;  %454 = vadd.xlane.f32.xlu0 %v453_v54 }
 0x2d8   :  { %v458_v31 = vpop.xlane.xlu1 %457  ;;  %v455_v52 = vpop.xlane.xlu0 %454 }
 0x2d9   :  { %v460_v32 = vadd.f32 %v458_v31, %v51_v29  ;;  %v459_v33 = vadd.f32 %v455_v52, %v50_v30 }
 0x2db   :  { %v462_v51 = vmax.f32 %v460_v32, 0.0  ;;  %v461_v34 = vmax.f32 %v459_v33, 0.0 }
 0x2dd   :  { %470 = vperm.xlu1 %568, %v462_v51   ;;  %465 = vperm.xlu0 %567, %v461_v34  }
 0x358   :  { %v471_v37 = vpop.permute.xlu1 %470  ;;  %v466_v38 = vpop.permute.xlu0 %465 }
 0x359   :  { %v474_v39 = vmul.f32 %v471_v37, %v53_v35  ;;  %v473_v40 = vmul.f32 %v466_v38, %v52_v36 }
 0x35b   :  { %v477_v41 = vsel %vm475_vm3, %v474_v39, 0.0  ;;  %v476_v42 = vsel %vm475_vm3, %v473_v40, 0.0 }
 0x35c   :  { %v478_v43 = vadd.f32 %v477_v41, %v476_v42 }
 0x35e   :  { %v479_v44 = vrot.slane %v478_v43, 4 }
 0x360   :  { %v480_v45 = vadd.f32 %v479_v44, %v478_v43 }
 0x362   :  { %v481_v46 = vrot.slane %v480_v45, 2 }
 0x364   :  { %v482_v47 = vadd.f32 %v481_v46, %v480_v45 }
 0x366   :  { %v483_v48 = vrot.slane %v482_v47, 1 }
 0x368   :  { %v484_v53 = vadd.f32 %v483_v48, %v482_v47 }
 0x36a   :  { %v485_v55 = vadd.f32 %v484_v53, %v54_v50 }
 0x36c   :  { %v486_v59 = vmax.f32 %v485_v55, 0.0 }
 0x36e   :  { %v487_v61 = vmul.f32 %v486_v59, %v55_v56 }
 0x370   :  { %v488_v62 = vsel %vm475_vm3, %v487_v61, 0.0 }
 0x371   :  { %489 = vadd.xlane.f32.xlu0 %v488_v62 }
 0x3fa   :  { %v490_v60 = vpop.xlane.xlu0 %489 }
 0x3fb   :  { %v491_v63 = vadd.f32 %v490_v60, %v56_v57 }
 0x3fd   :  { %v516_v0 = vmul.f32 -1.442695, %v491_v63 }
 0x3ff   :  { %569 = vpow2.f32 %v516_v0 }
 0x40c   :  { %v570_v58 = vpop.eup %569 }
 0x40d   :  { %v495_v1 = vadd.f32 1.0, %v570_v58 }
 0x40f   :  { %571 = vrcp.f32 %v495_v1 }
 0x41c   :  { %v572_v2 = vpop.eup %571 }
 0x41d   :  { %499 = vst.msk [vmem:[#allocation5] sm:$0x1] %vm498_vm4, %v572_v2 }
 0x41e   :  { %604 = shalt.err (!%p601_p9)
}
 0x41f   :  { %509 = dma.vmem_to_hbm [thread:$0]  %s507_s23, 16, %s775_s2, [#allocation4]  }
 0x420   :  { %615 = dma.done.wait [#allocation4], 16  }
 0x421   :  { %616 = vsyncadd [#allocation4], 4294967280 }
 0x422   :  { %513 = vsyncpa [#allocation3], 1 }
 0x423   :  { %514 = vsyncpa [#allocation4], 1 }

</bundles_post_ra>
